<compile_context>
chip_gen: v7x
topology: tpu7x:2x2x1
jax: 0.10.0
libtpu: 0.0.40
codegen_flags: <defaults>
</compile_context>

<pallas_src>
import math

import jax
import jax.numpy as jnp
from jax.experimental import pallas as pl
from jax.experimental.pallas import tpu as pltpu

LANE = 128
SUBLANE = 8

CONDITIONS = ("Structured3D", "ScanNet", "S3DIS")
VALID_INDEX = (
    (0, 1, 2, 3, 4, 5, 6, 7, 8, 11, 13, 14, 15, 16, 17, 18, 19, 20, 21, 23,
     25, 26, 33, 34, 35),
    (0, 1, 2, 3, 4, 5, 6, 7, 8, 9, 11, 12, 13, 15, 20, 22, 24, 25, 27, 34),
    (0, 1, 4, 5, 6, 7, 8, 10, 19, 29, 30, 31, 32),
)
NUM_CLASSES = 36


def _round_up(x, m):
    return (x + m - 1) // m * m


# ----------------------------- Pallas kernel ------------------------------ #

def ppt_fused_kernel(x_ref, bbw_ref, ctx_ref, wc_ref, g_ref, out_ref):
    """Fused backbone stand-in + proj_head + L2-normalize + class similarity + logit scale.

    x_ref   : VMEM (tile_n, cin_p) f32  -- raw point features (zero-padded cols/rows)
    bbw_ref : VMEM (cin_p, cbh)    f32  -- backbone stand-in weight (homog/pad cols zero)
    ctx_ref : VMEM (1, cbh)        f32  -- context row (+ 1.0 in the homogeneous column)
    wc_ref  : VMEM (cbh, k_pad)    bf16 -- exp(logit_scale) * [W @ cls_t ; b @ cls_t]
    g_ref   : VMEM (cbh, cbh)      bf16 -- [[W W^T, W b],[(W b)^T, b.b]]
    out_ref : VMEM (tile_n, k_pad) bf16 -- seg_logits tile (padded class cols are zero)
    """
    # backbone stand-in: feat_h = relu(x @ bb_w + ctx_row); ctx_row carries a 1.0 in the
    # homogeneous column so feat_h = [feat, 1, 0...] inside a single 128-lane slab.
    feat = jnp.maximum(
        jnp.dot(x_ref[...], bbw_ref[...], preferred_element_type=jnp.float32)
        + ctx_ref[...],
        0.0)
    feat_bf = feat.astype(jnp.bfloat16)
    # unnormalized, pre-scaled logits: feat_h @ (exp(ls) * [W @ cls_t ; b @ cls_t])
    sim = jnp.dot(feat_bf, wc_ref[...], preferred_element_type=jnp.float32)
    # ||proj||^2 = ||feat @ W + b||^2 = feat_h @ G_aug @ feat_h^T (quadratic form)
    fg = jnp.dot(feat_bf, g_ref[...], preferred_element_type=jnp.float32)
    inv_norm = jax.lax.rsqrt(jnp.sum(fg * feat, axis=-1, keepdims=True) + 1e-12)
    out_ref[...] = (inv_norm * sim).astype(out_ref.dtype)


def ppt_fused(x, bbw_p, ctx_row, wc_aug, g_aug, *, num_classes, in_channels,
              tile_n=1024, out_dtype=jnp.bfloat16,
              vmem_limit_bytes=32 * 1024 * 1024):
    """x: (N, in_channels) raw point features -> (N, num_classes) seg_logits."""
    N = x.shape[0]
    cin_p, cbh = bbw_p.shape
    k_pad = wc_aug.shape[1]

    # Large tiles amortize per-step overhead; clamp so the row grid has >= 2 steps
    # whenever N allows (both v7x TensorCores get work via "parallel" semantics).
    tile_n = max(SUBLANE, _round_up(int(tile_n), SUBLANE))
    if _round_up(N, SUBLANE) < 2 * tile_n:
        tile_n = max(SUBLANE, _round_up(pl.cdiv(N, 2), SUBLANE))
    n_pad = _round_up(max(N, tile_n), tile_n)

    # Only ~4*cin_p bytes/row of pad traffic (vs. 512 B/row for a padded feat slab).
    x_p = jnp.zeros((n_pad, cin_p), jnp.float32)
    x_p = x_p.at[:N, :in_channels].set(x.astype(jnp.float32))

    grid = (n_pad // tile_n,)
    out = pl.pallas_call(
        ppt_fused_kernel,
        out_shape=jax.ShapeDtypeStruct((n_pad, k_pad), out_dtype),
        grid_spec=pltpu.PrefetchScalarGridSpec(
            num_scalar_prefetch=0,
            grid=grid,
            in_specs=[
                pl.BlockSpec((tile_n, cin_p), lambda i: (i, 0)),   # raw point features
                pl.BlockSpec((cin_p, cbh), lambda i: (0, 0)),      # backbone stand-in W
                pl.BlockSpec((1, cbh), lambda i: (0, 0)),          # context row (+homog 1)
                pl.BlockSpec((cbh, k_pad), lambda i: (0, 0)),      # folded class matrix
                pl.BlockSpec((cbh, cbh), lambda i: (0, 0)),        # Gram matrix for norm
            ],
            out_specs=pl.BlockSpec((tile_n, k_pad), lambda i: (i, 0)),
        ),
        compiler_params=pltpu.CompilerParams(
            dimension_semantics=("parallel",),
            vmem_limit_bytes=vmem_limit_bytes),
    )(x_p, bbw_p, ctx_row, wc_aug, g_aug)
    # drop padded rows / padded (zero) class columns
    return out[:N, :num_classes]


# ------------------------- module-level wrapper ---------------------------- #

def init_params(key, *, in_channels, backbone_out_channels, context_channels,
                clip_dim):
    ks = jax.random.split(key, 6)
    p = {}
    # nn.Embedding(len(conditions), context_channels)
    p["embedding_table"] = jax.random.normal(
        ks[0], (len(CONDITIONS), context_channels), jnp.float32)
    # TODO(synk): real SpUNet-v1m3 / PT-v3m1 backbone (sparse conv / point transformer,
    # registry-built) has no clean Pallas translation; linear+ReLU stand-in instead.
    p["bb_w"] = 0.02 * jax.random.normal(
        ks[1], (in_channels, backbone_out_channels), jnp.float32)
    p["bb_ctx_w"] = 0.02 * jax.random.normal(
        ks[2], (context_channels, backbone_out_channels), jnp.float32)
    # proj_head = nn.Linear(backbone_out_channels, clip_dim)
    bound = 1.0 / math.sqrt(backbone_out_channels)
    p["proj_w"] = jax.random.uniform(
        ks[3], (backbone_out_channels, clip_dim), jnp.float32, -bound, bound)
    p["proj_b"] = jax.random.uniform(
        ks[4], (clip_dim,), jnp.float32, -bound, bound)
    # TODO(synk): CLIP text encoder is external; synthetic row-normalized embeddings.
    ce = jax.random.normal(ks[5], (NUM_CLASSES, clip_dim), jnp.float32)
    p["class_embedding"] = ce / jnp.linalg.norm(ce, axis=-1, keepdims=True)
    # clip_model.logit_scale is initialized to ln(1/0.07)
    p["logit_scale"] = jnp.float32(math.log(1.0 / 0.07))
    return p


def prepare_ppt(params):
    """One-time precompute of all kernel constants (hoisted out of the forward path)."""
    cin, cb = params["bb_w"].shape
    cbh = _round_up(cb + 1, LANE)          # feature lanes + homogeneous "1" column
    cin_p = _round_up(cin, SUBLANE)
    hom = cb                               # index of the homogeneous column

    w = params["proj_w"].astype(jnp.float32)       # (cb, d)
    b = params["proj_b"].astype(jnp.float32)       # (d,)
    scale = jnp.exp(params["logit_scale"]).astype(jnp.float32)

    # Gram matrix (condition-independent): feat_h @ G_aug @ feat_h^T == ||feat @ W + b||^2
    g_aug = jnp.zeros((cbh, cbh), jnp.float32)
    g_aug = (g_aug.at[:cb, :cb].set(w @ w.T)
                  .at[:cb, hom].set(w @ b)
                  .at[hom, :cb].set(w @ b)
                  .at[hom, hom].set(jnp.dot(b, b)))

    # backbone stand-in weight, zero-padded (homogeneous / pad columns stay zero)
    bbw_p = jnp.zeros((cin_p, cbh), jnp.float32).at[:cin, :cb].set(params["bb_w"])

    per_cond = {}
    for ci, cond in enumerate(CONDITIONS):
        valid = jnp.asarray(VALID_INDEX[ci], jnp.int32)
        k = len(VALID_INDEX[ci])
        k_pad = _round_up(k, LANE)
        cls_t = params["class_embedding"][valid].T.astype(jnp.float32)   # (d, k)
        # fold proj weight, proj bias and exp(logit_scale) into one (cbh, k_pad) matrix
        wc_aug = jnp.zeros((cbh, k_pad), jnp.float32)
        wc_aug = (wc_aug.at[:cb, :k].set(w @ cls_t)
                        .at[hom, :k].set(b @ cls_t)) * scale
        # data-driven context row for this dataset, plus homogeneous 1.0
        ctx_row = params["embedding_table"][ci] @ params["bb_ctx_w"]      # (cb,)
        ctx_p = (jnp.zeros((1, cbh), jnp.float32)
                 .at[0, :cb].set(ctx_row)
                 .at[0, hom].set(1.0))
        per_cond[cond] = dict(wc_aug=wc_aug.astype(jnp.bfloat16),
                              ctx_row=ctx_p,
                              num_classes=k)

    return dict(bbw=bbw_p,
                g_aug=g_aug.astype(jnp.bfloat16),
                per_cond=per_cond,
                in_channels=cin)


def point_prompt_training_forward(prepared, data_dict, *, tile_n=1024,
                                  out_dtype=jnp.bfloat16):
    """Mirrors PointPromptTraining.forward (eval mode, no 'segment' key)."""
    condition = data_dict["condition"][0]
    assert condition in CONDITIONS
    pc = prepared["per_cond"][condition]
    # TODO(synk): training / 'segment' loss path (build_criteria) not implemented.
    seg_logits = ppt_fused(
        data_dict["feat"], prepared["bbw"], pc["ctx_row"], pc["wc_aug"],
        prepared["g_aug"], num_classes=pc["num_classes"],
        in_channels=prepared["in_channels"], tile_n=tile_n, out_dtype=out_dtype)
    return {"seg_logits": seg_logits}


# ----------------------- plain-JAX f32 reference --------------------------- #

def forward_ref(params, data_dict):
    condition = data_dict["condition"][0]
    ci = CONDITIONS.index(condition)
    context = params["embedding_table"][ci][None, :]
    feat = jnp.maximum(
        data_dict["feat"] @ params["bb_w"] + context @ params["bb_ctx_w"], 0.0)
    proj = feat @ params["proj_w"] + params["proj_b"][None, :]
    proj = proj / jnp.linalg.norm(proj, axis=-1, keepdims=True)
    valid = jnp.asarray(VALID_INDEX[ci], jnp.int32)
    sim = proj @ params["class_embedding"][valid].T
    return jnp.exp(params["logit_scale"]) * sim


if __name__ == "__main__":
    key = jax.random.PRNGKey(0)
    k_param, k_coord, k_feat = jax.random.split(key, 3)

    N = 300                 # points (not a multiple of 8/128 -> exercises row padding)
    IN_CH = 6               # coord + color channels
    BB_OUT = 96             # backbone_out_channels
    CTX = 256               # context_channels
    CLIP_DIM = 512          # ViT-B/16 text projection dim

    params = init_params(k_param, in_channels=IN_CH,
                         backbone_out_channels=BB_OUT,
                         context_channels=CTX, clip_dim=CLIP_DIM)
    prepared = prepare_ppt(params)      # one-time constant precompute (hoisted)

    data_dict = {
        "condition": ["ScanNet"],
        "coord": jax.random.normal(k_coord, (N, 3), jnp.float32),
        "feat": jax.random.normal(k_feat, (N, IN_CH), jnp.float32),
    }

    out = point_prompt_training_forward(prepared, data_dict, tile_n=1024)
    seg_logits = jax.block_until_ready(out["seg_logits"])

    cond_idx = CONDITIONS.index(data_dict["condition"][0])
    K = len(VALID_INDEX[cond_idx])
    assert seg_logits.shape == (N, K), seg_logits.shape
    seg_f32 = seg_logits.astype(jnp.float32)
    assert bool(jnp.all(jnp.isfinite(seg_f32)))

    ref = forward_ref(params, data_dict)
    max_err = float(jnp.max(jnp.abs(seg_f32 - ref)))
    # bf16 constant matrices / bf16 output with f32 MXU accumulation -> loose tolerance
    assert jnp.allclose(seg_f32, ref, atol=2e-1, rtol=5e-2), max_err

    print("KERNEL_OK")
</pallas_src>

<mosaic_0001>
module attributes {stable_mosaic.version = 11 : i64} {
  func.func @ppt_fused_kernel(%arg0: i32, %arg1: memref<152x8xf32, #tpu.memory_space<vmem>>, %arg2: memref<8x128xf32, #tpu.memory_space<vmem>>, %arg3: memref<1x128xf32, #tpu.memory_space<vmem>>, %arg4: memref<128x128xbf16, #tpu.memory_space<vmem>>, %arg5: memref<128x128xbf16, #tpu.memory_space<vmem>>, %arg6: memref<152x128xbf16, #tpu.memory_space<vmem>>) attributes {dimension_semantics = [#tpu.dimension_semantics<parallel>], iteration_bounds = array<i64: 2>, scalar_prefetch = 0 : i64, scratch_operands = 0 : i64, tpu.core_type = #tpu.core_type<tc>, window_params = [{transform_indices = @transform_0, window_bounds = array<i64: 152, 8>}, {pipeline_mode = #tpu.pipeline_mode<synchronous>, transform_indices = @transform_1, window_bounds = array<i64: 8, 128>}, {pipeline_mode = #tpu.pipeline_mode<synchronous>, transform_indices = @transform_2, window_bounds = array<i64: 1, 128>}, {pipeline_mode = #tpu.pipeline_mode<synchronous>, transform_indices = @transform_3, window_bounds = array<i64: 128, 128>}, {pipeline_mode = #tpu.pipeline_mode<synchronous>, transform_indices = @transform_4, window_bounds = array<i64: 128, 128>}, {transform_indices = @transform_5, window_bounds = array<i64: 152, 128>}]} {
    %c0 = arith.constant 0 : index
    %c0_0 = arith.constant 0 : index
    %0 = vector.load %arg1[%c0, %c0_0] : memref<152x8xf32, #tpu.memory_space<vmem>>, vector<152x8xf32>
    %c0_1 = arith.constant 0 : index
    %c0_2 = arith.constant 0 : index
    %1 = vector.load %arg2[%c0_1, %c0_2] : memref<8x128xf32, #tpu.memory_space<vmem>>, vector<8x128xf32>
    %cst = arith.constant dense<0.000000e+00> : vector<152x128xf32>
    %2 = tpu.matmul %0, %1, %cst {dimension_numbers = #tpu.dot_dimension_numbers<[1], [0], [0], [1], [0, 0, 1, 1], [], []>} : vector<152x8xf32>, vector<8x128xf32>, vector<152x128xf32> -> vector<152x128xf32>
    %c0_3 = arith.constant 0 : index
    %c0_4 = arith.constant 0 : index
    %3 = vector.load %arg3[%c0_3, %c0_4] : memref<1x128xf32, #tpu.memory_space<vmem>>, vector<1x128xf32>
    %4 = vector.broadcast %3 : vector<1x128xf32> to vector<152x128xf32>
    %5 = arith.addf %2, %4 : vector<152x128xf32>
    %cst_5 = arith.constant 0.000000e+00 : f32
    %6 = vector.broadcast %cst_5 : f32 to vector<152x128xf32>
    %7 = arith.maximumf %5, %6 : vector<152x128xf32>
    %8 = arith.truncf %7 : vector<152x128xf32> to vector<152x128xbf16>
    %c0_6 = arith.constant 0 : index
    %c0_7 = arith.constant 0 : index
    %9 = vector.load %arg4[%c0_6, %c0_7] : memref<128x128xbf16, #tpu.memory_space<vmem>>, vector<128x128xbf16>
    %cst_8 = arith.constant dense<0.000000e+00> : vector<152x128xf32>
    %10 = tpu.matmul %8, %9, %cst_8 {dimension_numbers = #tpu.dot_dimension_numbers<[1], [0], [0], [1], [0, 0, 1, 1], [], []>} : vector<152x128xbf16>, vector<128x128xbf16>, vector<152x128xf32> -> vector<152x128xf32>
    %c0_9 = arith.constant 0 : index
    %c0_10 = arith.constant 0 : index
    %11 = vector.load %arg5[%c0_9, %c0_10] : memref<128x128xbf16, #tpu.memory_space<vmem>>, vector<128x128xbf16>
    %cst_11 = arith.constant dense<0.000000e+00> : vector<152x128xf32>
    %12 = tpu.matmul %8, %11, %cst_11 {dimension_numbers = #tpu.dot_dimension_numbers<[1], [0], [0], [1], [0, 0, 1, 1], [], []>} : vector<152x128xbf16>, vector<128x128xbf16>, vector<152x128xf32> -> vector<152x128xf32>
    %13 = arith.mulf %12, %7 : vector<152x128xf32>
    %cst_12 = arith.constant dense<0.000000e+00> : vector<152xf32>
    %14 = vector.multi_reduction <add>, %13, %cst_12 [1] : vector<152x128xf32> to vector<152xf32>
    %15 = vector.shape_cast %14 : vector<152xf32> to vector<152x1xf32>
    %cst_13 = arith.constant 9.99999996E-13 : f32
    %16 = vector.broadcast %cst_13 : f32 to vector<152x1xf32>
    %17 = arith.addf %15, %16 : vector<152x1xf32>
    %18 = math.rsqrt %17 : vector<152x1xf32>
    %19 = vector.broadcast %18 : vector<152x1xf32> to vector<152x128xf32>
    %20 = arith.mulf %19, %10 : vector<152x128xf32>
    %21 = arith.truncf %20 : vector<152x128xf32> to vector<152x128xbf16>
    %c0_14 = arith.constant 0 : index
    %c0_15 = arith.constant 0 : index
    %22 = vector.load %arg6[%c0_14, %c0_15] : memref<152x128xbf16, #tpu.memory_space<vmem>>, vector<152x128xbf16>
    tpu.vector_store %arg6[%c0_14, %c0_15], %21 {strides = array<i32>} : memref<152x128xbf16, #tpu.memory_space<vmem>>, vector<152x128xbf16>,
    return
  }
  func.func @transform_0(%arg0: i32) -> (i32, i32) {
    %c0_i32 = arith.constant 0 : i32
    %c0_i32_0 = arith.constant 0 : i32
    return %arg0, %c0_i32 : i32, i32
  }
  func.func @transform_1(%arg0: i32) -> (i32, i32) {
    %c0_i32 = arith.constant 0 : i32
    %c0_i32_0 = arith.constant 0 : i32
    %c0_i32_1 = arith.constant 0 : i32
    return %c0_i32, %c0_i32_0 : i32, i32
  }
  func.func @transform_2(%arg0: i32) -> (i32, i32) {
    %c0_i32 = arith.constant 0 : i32
    %c0_i32_0 = arith.constant 0 : i32
    %c0_i32_1 = arith.constant 0 : i32
    return %c0_i32, %c0_i32_0 : i32, i32
  }
  func.func @transform_3(%arg0: i32) -> (i32, i32) {
    %c0_i32 = arith.constant 0 : i32
    %c0_i32_0 = arith.constant 0 : i32
    %c0_i32_1 = arith.constant 0 : i32
    return %c0_i32, %c0_i32_0 : i32, i32
  }
  func.func @transform_4(%arg0: i32) -> (i32, i32) {
    %c0_i32 = arith.constant 0 : i32
    %c0_i32_0 = arith.constant 0 : i32
    %c0_i32_1 = arith.constant 0 : i32
    return %c0_i32, %c0_i32_0 : i32, i32
  }
  func.func @transform_5(%arg0: i32) -> (i32, i32) {
    %c0_i32 = arith.constant 0 : i32
    %c0_i32_0 = arith.constant 0 : i32
    return %arg0, %c0_i32 : i32, i32
  }
}

</mosaic_0001>

<bundles_post_ra>
// kernel: tpu_custom_call.1
= control target key start
LH: loop header
LB: loop body
LE: loop exit
PB: predicated region body
PF: predicated region fallthrough
CT: control target
= control target key end

     0   :  { %10 = vsyncpa [#allocation3], 0  ;;  %s2184_s0 = inlined_call_operand.vmem [shape: f32[304,8], index: 0, kind: input, shape index: {}]   ;;  %s2185_s1 = inlined_call_operand.vmem [shape: f32[8,128], index: 1, kind: input, shape index: {}]   ;;  %s2186_s2 = inlined_call_operand.vmem [shape: f32[1,128], index: 2, kind: input, shape index: {}]   ;;  %s2187_s3 = inlined_call_operand.vmem [shape: bf16[128,128], index: 3, kind: input, shape index: {}]   ;;  %s2188_s4 = inlined_call_operand.vmem [shape: bf16[128,128], index: 4, kind: input, shape index: {}]   ;;  %s2189_s5 = inlined_call_operand.hbm [shape: bf16[304,128], index: 5, kind: output, shape index: {}]  }
   0x1   :  { %12 = vsyncpa [#allocation3 + $0x1], 0  ;;  %s1675_s18 = smov 0   ;;  %s1677_s19 = smov 0  }
   0x2   :  { %s1679_s20 = smov 0   ;;  %s1681_s21 = smov 0  }
   0x3 LB: > { %s1696_s22 = sadd.s32 4294967295, %s1638_s21   ;;  %s1139_s23 = sadd.s32 4294967294, %s1638_s21   ;;  %s1638_s21 = sphi %s1681_s21, %s2195_s21   ;;  %s1634_s20 = sphi %s1679_s20, %s2194_s20   ;;  %s1630_s19 = sphi %s1677_s19, %s2193_s19   ;;  %s1626_s18 = sphi %s1675_s18, %s2192_s18  }
   0x4   : > { %s1700_s24 = sadd.s32 1, %s1638_s21   ;;  %s135_s25 = sadd.s32 1, %s1634_s20 }
   0x5   : > { %s132_s26 = ssub.s32 %s1638_s21, %s1700_s24  ;;  %p145_p0 = scmp.ne.s32.totalorder %s1634_s20, %s1630_s19 }
   0x6   : > { %p133_p1 = scmp.eq.s32.totalorder %s132_s26, 0  ;;  %p146_p2 = scmp.eq.s32.totalorder %s1696_s22, 1 }
   0x7   : > { %p151_p3 = scmp.ne.s32.totalorder %s1630_s19, %s1626_s18  ;;  %p152_p4 = scmp.eq.s32.totalorder %s1139_s23, 1 }
   0x8   : > { %s1711_s27 = scalar_select %p133_p1, %s1634_s20, %s135_s25  }
   0x9   : > { %p1713_p5 = por %p146_p2, %p145_p0  ;;  %p1717_p6 = por %p152_p4, %p151_p3 }
   0xa   : > { %p1142_p7 = scmp.ge.s32.totalorder %s1638_s21, 1  ;;  %p191_p8 = scmp.lt.s32.totalorder %s1638_s21, 3 }
   0xc   : > { %p192_p9 = pnand %p1142_p7, %p191_p8 }
   0xd   : > { %v246_v0 = vld [vmem:[%s2185_s1] sm:$0xff] (!%p192_p9)  ;;  %s219_s7 = smul.u32 (!%p192_p9), 19, %s1696_s22  ;;  %v1640_v2 = vmov (!%p192_p9), 0.0   ;;  %vm1641_vm0 = vmmov (!%p192_p9), 0   ;;  %v1524_v4 = vld [vmem:[%s2187_s3 + $0x8] sm:$0xff] (!%p192_p9)   ;;  %v1526_v5 = vld [vmem:[%s2187_s3 + $0x10] sm:$0xff] (!%p192_p9)  }
   0xe   : > { %195 = sbr.rel (%p192_p9) target bundleno = 732 (0x2dc), region = 40  ;;  %v1522_v1 = vld [vmem:[%s2187_s3] sm:$0xff] (!%p192_p9)   ;;  %1331 = vmatprep.subr.mxu0 (!%p192_p9), %v1640_v2  ;;  %1333 = vmatprep.mubr.msk.f32.mxu0 (!%p192_p9), %vm1641_vm0, %v1640_v2  ;;  %vm254_vm1 = vcmask (!%p192_p9), 64512   ;;  %v1753_v6 = vld [vmem:[%s2188_s4 + $0x8] sm:$0xff] (!%p192_p9)   ;;  %v1528_v8 = vld [vmem:[%s2187_s3 + $0x18] sm:$0xff] (!%p192_p9)   ;;  %s216_s14 = sand.u32 (!%p192_p9), 1, %s1630_s19  }
   0xf   : > { %1332 = vmatpush3.msra.mxu0 (!%p192_p9), %v246_v0  ;;  %p220_p10 = scmp.lt.s32.totalorder (!%p192_p9), %s219_s7, 37  ;;  %1390 = vmatprep.subr.bf16.mxu1 (!%p192_p9), %v1522_v1  ;;  %v1736_v3 = vld [vmem:[%s2188_s4] sm:$0xff] (!%p192_p9)   ;;  %v1768_v10 = vld [vmem:[%s2188_s4 + $0x10] sm:$0xff] (!%p192_p9)   ;;  %v1779_v12 = vld [vmem:[%s2188_s4 + $0x18] sm:$0xff] (!%p192_p9)   ;;  %s1478_s15 = smul.u32 (!%p192_p9), 76, %s216_s14 }
  0x10   : > { %1391 = vmatpush3.bf16.msra.mxu1 (!%p192_p9), %v1522_v1  ;;  %1426 = vmatprep.subr.bf16.mxu0 (!%p192_p9), %v1736_v3  ;;  %v1530_v29 = vld [vmem:[%s2187_s3 + $0x20] sm:$0xff] (!%p192_p9)   ;;  %v1532_v31 = vld [vmem:[%s2187_s3 + $0x28] sm:$0xff] (!%p192_p9)   ;;  %v1534_v33 = vld [vmem:[%s2187_s3 + $0x30] sm:$0xff] (!%p192_p9)   ;;  %s1221_s17 = smul.u32 (!%p192_p9), 1216, %s1696_s22  ;;  %s2143_s22 = scalar_lea.sflag (!%p192_p9), [#allocation3], %s216_s14 }
  0x11   : > { %1392 = vmatprep.subr.bf16.mxu1 (!%p192_p9), %v1524_v4  ;;  %v1855_v30 = vld [vmem:[%s2188_s4 + $0x20] sm:$0xff] (!%p192_p9)   ;;  %v1865_v32 = vld [vmem:[%s2188_s4 + $0x28] sm:$0xff] (!%p192_p9)   ;;  %v1875_v34 = vld [vmem:[%s2188_s4 + $0x30] sm:$0xff] (!%p192_p9)   ;;  %s1642_s8 = smov (!%p192_p9), [#allocation2]  }
  0x12   : > { %v1536_v35 = vld [vmem:[%s2187_s3 + $0x38] sm:$0xff] (!%p192_p9)   ;;  %v1893_v37 = vld [vmem:[%s2186_s2] ss:$0 sm:$0xff] (!%p192_p9)  ;;  %s2135_s30 = scalar_lea.hbm (!%p192_p9), %s2189_s5, %s1221_s17 }
  0x13   : > { %v1885_v36 = vld [vmem:[%s2188_s4 + $0x38] sm:$0xff] (!%p192_p9)  }
  0x14   : > { %1393 = vmatpush3.bf16.msra.mxu1 (!%p192_p9), %v1524_v4 }
  0x15   : > { %s2197_s7 = smov (!%p220_p10, %s219_s7), 37  ;;  %1394 = vmatprep.subr.bf16.mxu1 %v1526_v5 }
  0x16   : > { %s1143_s16 = sshll.u32 %s2197_s7, 3  ;;  %s1580_s7 = sshll.u32 %s1642_s8, 4  ;;  %s1581_s7 = int_to_ptr.vmem [resolvable:$false] %s1580_s7 }
  0x17   : > { %s1748_s25 = scalar_lea.vmem %s2184_s0, %s1143_s16  ;;  %s2105_s16 = scalar_lea.vmem [#allocation2], %s1478_s15 }
  0x18   : > { %v227_v7 = vld [vmem:[%s1748_s25] sm:$0xff]  ;;  %v228_v9 = vld [vmem:[%s1748_s25 + $0x8] sm:$0xff]  ;;  %1395 = vmatpush3.bf16.msra.mxu1 %v1526_v5  ;;  %v229_v11 = vld [vmem:[%s1748_s25 + $0x10] sm:$0xff]  ;;  %s1077_s23 = sshll.u32 %s2105_s16, 4  ;;  %s1582_s9 = scalar_lea.vmem %s1581_s7, 2432  ;;  %s2137_s23 = int_to_ptr.vmem [resolvable:$true] %s1077_s23 }
  0x19   : > { %1334 = vmatmul.mubr.msk.f32.vlgmr.msra.gmra.mrb[0].mxu0 %vm254_vm1, %v227_v7  ;;  %1396 = vmatprep.subr.bf16.mxu1 %v1528_v8  ;;  %v230_v13 = vld [vmem:[%s1748_s25 + $0x18] sm:$0xff]  ;;  %v231_v14 = vld [vmem:[%s1748_s25 + $0x20] sm:$0xff]  ;;  %v232_v15 = vld [vmem:[%s1748_s25 + $0x28] sm:$0xff]  ;;  %s1576_s6 = scalar_lea.vmem %s2137_s23, 1216  ;;  %p1583_p0 = scmp.lt.s32.totalorder %s2137_s23, %s1581_s7 }
  0x1a   : > { %1336 = vmatprep.mubr.msk.f32.mxu0 %vm1641_vm0, %v1640_v2  ;;  %1427 = vmatpush3.bf16.msra.mxu0 %v1736_v3  ;;  %v233_v16 = vld [vmem:[%s1748_s25 + $0x30] sm:$0xff]  ;;  %v234_v17 = vld [vmem:[%s1748_s25 + $0x38] sm:$0xff]  ;;  %v235_v18 = vld [vmem:[%s1748_s25 + $0x40] sm:$0xff]  ;;  %p1577_p11 = scmp.ne.s32.totalorder %s2137_s23, %s1576_s6  ;;  %p1584_p1 = scmp.lt.s32.totalorder %s1582_s9, %s1576_s6 }
  0x1b   : > { %1428 = vmatprep.subr.bf16.mxu0 %v1753_v6  ;;  %v236_v19 = vld [vmem:[%s1748_s25 + $0x48] sm:$0xff]  ;;  %v237_v20 = vld [vmem:[%s1748_s25 + $0x50] sm:$0xff]  ;;  %v238_v21 = vld [vmem:[%s1748_s25 + $0x58] sm:$0xff] }
  0x1c   : > { %1397 = vmatpush3.bf16.msra.mxu1 %v1528_v8  ;;  %v239_v22 = vld [vmem:[%s1748_s25 + $0x60] sm:$0xff]  ;;  %v240_v23 = vld [vmem:[%s1748_s25 + $0x68] sm:$0xff]  ;;  %v241_v24 = vld [vmem:[%s1748_s25 + $0x70] sm:$0xff]  ;;  %p1578_p12 = pnand %p1577_p11, %p1713_p5  ;;  %p1585_p2 = por %p1584_p1, %p1583_p0 }
  0x1d   : > { %1337 = vmatmul.mubr.msk.f32.gmra.mrb[2].mxu0 %vm254_vm1, %v228_v9  ;;  %v242_v25 = vld [vmem:[%s1748_s25 + $0x78] sm:$0xff]  ;;  %v243_v26 = vld [vmem:[%s1748_s25 + $0x80] sm:$0xff]  ;;  %v244_v27 = vld [vmem:[%s1748_s25 + $0x88] sm:$0xff]  ;;  %1398 = vmatprep.subr.bf16.mxu1 %v1530_v29 }
  0x1e   : > { %1339 = vmatprep.mubr.msk.f32.mxu0 %vm1641_vm0, %v1640_v2  ;;  %1429 = vmatpush3.bf16.msra.mxu0 %v1753_v6  ;;  %v245_v28 = vld [vmem:[%s1748_s25 + $0x90] sm:$0xff]  ;;  %p1579_p13 = pneg %p1578_p12 }
  0x1f   : > { %1430 = vmatprep.subr.bf16.mxu0 %v1768_v10 }
  0x20   : > { %1399 = vmatpush3.bf16.msra.mxu1 %v1530_v29  ;;  %p1586_p3 = pnand %p1585_p2, %p1579_p13 }
  0x21   : > { %1340 = vmatmul.mubr.msk.f32.gmra.mrb[4].mxu0 %vm254_vm1, %v229_v11  ;;  %1400 = vmatprep.subr.bf16.mxu1 %v1532_v31 }
  0x22   : > { %1342 = vmatprep.mubr.msk.f32.mxu0 %vm1641_vm0, %v1640_v2  ;;  %1431 = vmatpush3.bf16.msra.mxu0 %v1768_v10 }
  0x23   : > { %1432 = vmatprep.subr.bf16.mxu0 %v1779_v12 }
  0x24   : > { %1401 = vmatpush3.bf16.msra.mxu1 %v1532_v31 }
  0x25   : > { %1343 = vmatmul.mubr.msk.f32.gmra.mrb[6].mxu0 %vm254_vm1, %v230_v13  ;;  %1402 = vmatprep.subr.bf16.mxu1 %v1534_v33 }
  0x26   : > { %1345 = vmatprep.mubr.msk.f32.mxu0 %vm1641_vm0, %v1640_v2  ;;  %1433 = vmatpush3.bf16.msra.mxu0 %v1779_v12 }
  0x27   : > { %1434 = vmatprep.subr.bf16.mxu0 %v1855_v30 }
  0x28   : > { %1403 = vmatpush3.bf16.msra.mxu1 %v1534_v33 }
  0x29   : > { %1346 = vmatmul.mubr.msk.f32.gmra.mrb[8].mxu0 %vm254_vm1, %v231_v14  ;;  %1404 = vmatprep.subr.bf16.mxu1 %v1536_v35 }
  0x2a   : > { %1348 = vmatprep.mubr.msk.f32.mxu0 %vm1641_vm0, %v1640_v2  ;;  %1435 = vmatpush3.bf16.msra.mxu0 %v1855_v30 }
  0x2b   : > { %1436 = vmatprep.subr.bf16.mxu0 %v1865_v32 }
  0x2c   : > { %1405 = vmatpush3.bf16.msra.mxu1 %v1536_v35 }
  0x2d   : > { %1349 = vmatmul.mubr.msk.f32.gmra.mrb[10].mxu0 %vm254_vm1, %v232_v15  ;;  %1462 = vmatprep.subr.bf16.mxu1 %v1736_v3 }
  0x2e   : > { %1351 = vmatprep.mubr.msk.f32.mxu0 %vm1641_vm0, %v1640_v2  ;;  %1437 = vmatpush3.bf16.msra.mxu0 %v1865_v32 }
  0x2f   : > { %1438 = vmatprep.subr.bf16.mxu0 %v1875_v34 }
  0x31   : > { %1352 = vmatmul.mubr.msk.f32.gmra.mrb[12].mxu0 %vm254_vm1, %v233_v16 }
  0x32   : > { %1354 = vmatprep.mubr.msk.f32.mxu0 %vm1641_vm0, %v1640_v2  ;;  %1439 = vmatpush3.bf16.msra.mxu0 %v1875_v34 }
  0x33   : > { %1440 = vmatprep.subr.bf16.mxu0 %v1885_v36 }
  0x35   : > { %1355 = vmatmul.mubr.msk.f32.gmra.mrb[14].mxu0 %vm254_vm1, %v234_v17 }
  0x36   : > { %1357 = vmatprep.mubr.msk.f32.mxu0 %vm1641_vm0, %v1640_v2  ;;  %1441 = vmatpush3.bf16.msra.mxu0 %v1885_v36 }
  0x39   : > { %1358 = vmatmul.mubr.msk.f32.gmra.mrb[16].mxu0 %vm254_vm1, %v235_v18 }
  0x3a   : > { %1360 = vmatprep.mubr.msk.f32.mxu0 %vm1641_vm0, %v1640_v2 }
  0x3d   : > { %1361 = vmatmul.mubr.msk.f32.gmra.mrb[18].mxu0 %vm254_vm1, %v236_v19 }
  0x3e   : > { %1363 = vmatprep.mubr.msk.f32.mxu0 %vm1641_vm0, %v1640_v2 }
  0x41   : > { %1364 = vmatmul.mubr.msk.f32.gmra.mrb[20].mxu0 %vm254_vm1, %v237_v20 }
  0x42   : > { %1366 = vmatprep.mubr.msk.f32.mxu0 %vm1641_vm0, %v1640_v2 }
  0x45   : > { %1367 = vmatmul.mubr.msk.f32.gmra.mrb[22].mxu0 %vm254_vm1, %v238_v21 }
  0x46   : > { %1369 = vmatprep.mubr.msk.f32.mxu0 %vm1641_vm0, %v1640_v2 }
  0x49   : > { %1370 = vmatmul.mubr.msk.f32.gmra.mrb[24].mxu0 %vm254_vm1, %v239_v22 }
  0x4a   : > { %1372 = vmatprep.mubr.msk.f32.mxu0 %vm1641_vm0, %v1640_v2 }
  0x4d   : > { %1373 = vmatmul.mubr.msk.f32.gmra.mrb[26].mxu0 %vm254_vm1, %v240_v23 }
  0x4e   : > { %1375 = vmatprep.mubr.msk.f32.mxu0 %vm1641_vm0, %v1640_v2 }
  0x51   : > { %1376 = vmatmul.mubr.msk.f32.gmra.mrb[28].mxu0 %vm254_vm1, %v241_v24 }
  0x52   : > { %1378 = vmatprep.mubr.msk.f32.mxu0 %vm1641_vm0, %v1640_v2 }
  0x55   : > { %1379 = vmatmul.mubr.msk.f32.gmra.mrb[30].mxu0 %vm254_vm1, %v242_v25 }
  0x56   : > { %1381 = vmatprep.mubr.msk.f32.mxu0 %vm1641_vm0, %v1640_v2 }
  0x59   : > { %1382 = vmatmul.mubr.msk.f32.gmra.mrb[32].mxu0 %vm254_vm1, %v243_v26 }
  0x5a   : > { %1384 = vmatprep.mubr.msk.f32.mxu0 %vm1641_vm0, %v1640_v2 }
  0x5d   : > { %1385 = vmatmul.mubr.msk.f32.gmra.mrb[34].mxu0 %vm254_vm1, %v244_v27 }
  0x5e   : > { %1387 = vmatprep.mubr.msk.f32.mxu0 %vm1641_vm0, %v1640_v2 }
  0x61   : > { %1388 = vmatmul.mubr.msk.f32.gmra.mrb[36].mxu0 %vm254_vm1, %v245_v28 }
  0xec   : > { %v378_v38 = vpop.f32.mrb[0].mxu0 }
  0xed   : > { %v1335_v39 = vpop.f32.mrb[1].mxu0  ;;  %v1896_v40 = vadd.f32 %v1893_v37, %v378_v38 }
  0xef   : > { %v472_v44 = vmax.f32 %v1896_v40, 0.0 }
  0xf0   : > { %v383_v41 = vpop.f32.mrb[2].mxu0 }
  0xf1   : > { %v1899_v42 = vadd.f32 %v1893_v37, %v383_v41  ;;  %v1338_v43 = vpop.f32.mrb[3].mxu0 }
  0xf3   : > { %v473_v45 = vmax.f32 %v1899_v42, 0.0 }
  0xf4   : > { %v388_v46 = vpop.f32.mrb[4].mxu0 }
  0xf5   : > { %v1341_v47 = vpop.f32.mrb[5].mxu0  ;;  %v491_v48 = vpack.c.bf16 %v473_v45, %v472_v44  ;;  %v1908_v49 = vadd.f32 %v1893_v37, %v388_v46 }
  0xf7   : > { %1406 = vmatprep.mubr.bf16.mxu1 %v491_v48  ;;  %1442 = vmatprep.mubr.bf16.mxu0 %v491_v48  ;;  %v474_v53 = vmax.f32 %v1908_v49, 0.0 }
  0xf8   : > { %v393_v50 = vpop.f32.mrb[6].mxu0 }
  0xf9   : > { %v1911_v51 = vadd.f32 %v1893_v37, %v393_v50  ;;  %v1344_v52 = vpop.f32.mrb[7].mxu0 }
  0xfb   : > { %v475_v54 = vmax.f32 %v1911_v51, 0.0 }
  0xfc   : > { %v398_v55 = vpop.f32.mrb[8].mxu0 }
  0xfd   : > { %v492_v56 = vpack.c.bf16 %v475_v54, %v474_v53  ;;  %v1347_v57 = vpop.f32.mrb[9].mxu0  ;;  %v1920_v58 = vadd.f32 %v1893_v37, %v398_v55 }
  0xff   : > { %1407 = vmatmul.mubr.bf16.vlgmr.msra.gmra.mrb[0].mxu1 %v492_v56  ;;  %1443 = vmatmul.mubr.bf16.vlgmr.msra.gmra.mrb[40].mxu0 %v492_v56  ;;  %v476_v62 = vmax.f32 %v1920_v58, 0.0 }
 0x100   : > { %v403_v59 = vpop.f32.mrb[10].mxu0  ;;  %1470 = vmatpush3.bf16.msra.mxu1 %v1736_v3 }
 0x101   : > { %v1924_v60 = vadd.f32 %v1893_v37, %v403_v59  ;;  %v1350_v61 = vpop.f32.mrb[11].mxu0  ;;  %1463 = vmatprep.subr.bf16.mxu1 %v1753_v6 }
 0x103   : > { %v477_v63 = vmax.f32 %v1924_v60, 0.0 }
 0x104   : > { %v408_v0 = vpop.f32.mrb[12].mxu0  ;;  %1471 = vmatpush3.bf16.msra.mxu1 %v1753_v6 }
 0x105   : > { %v493_v1 = vpack.c.bf16 %v477_v63, %v476_v62  ;;  %v1353_v2 = vpop.f32.mrb[13].mxu0  ;;  %1464 = vmatprep.subr.bf16.mxu1 %v1768_v10  ;;  %v1936_v3 = vadd.f32 %v1893_v37, %v408_v0 }
 0x107   : > { %1410 = vmatprep.mubr.bf16.mxu1 %v493_v1  ;;  %1446 = vmatprep.mubr.bf16.mxu0 %v493_v1  ;;  %v478_v7 = vmax.f32 %v1936_v3, 0.0 }
 0x108   : > { %v413_v4 = vpop.f32.mrb[14].mxu0  ;;  %1472 = vmatpush3.bf16.msra.mxu1 %v1768_v10 }
 0x109   : > { %v1940_v5 = vadd.f32 %v1893_v37, %v413_v4  ;;  %v1356_v6 = vpop.f32.mrb[15].mxu0  ;;  %1465 = vmatprep.subr.bf16.mxu1 %v1779_v12 }
 0x10b   : > { %v479_v8 = vmax.f32 %v1940_v5, 0.0 }
 0x10c   : > { %v418_v9 = vpop.f32.mrb[16].mxu0  ;;  %1473 = vmatpush3.bf16.msra.mxu1 %v1779_v12 }
 0x10d   : > { %v494_v11 = vpack.c.bf16 %v479_v8, %v478_v7  ;;  %v1359_v13 = vpop.f32.mrb[17].mxu0  ;;  %1466 = vmatprep.subr.bf16.mxu1 %v1855_v30  ;;  %v1952_v10 = vadd.f32 %v1893_v37, %v418_v9 }
 0x10f   : > { %1411 = vmatmul.mubr.bf16.gmra.mrb[4].mxu1 %v494_v11  ;;  %1447 = vmatmul.mubr.bf16.gmra.mrb[44].mxu0 %v494_v11  ;;  %v480_v16 = vmax.f32 %v1952_v10, 0.0 }
 0x110   : > { %v423_v14 = vpop.f32.mrb[18].mxu0  ;;  %1474 = vmatpush3.bf16.msra.mxu1 %v1855_v30 }
 0x111   : > { %v1956_v15 = vadd.f32 %v1893_v37, %v423_v14  ;;  %v1362_v12 = vpop.f32.mrb[19].mxu0  ;;  %1467 = vmatprep.subr.bf16.mxu1 %v1865_v32 }
 0x113   : > { %v481_v17 = vmax.f32 %v1956_v15, 0.0 }
 0x114   : > { %v428_v18 = vpop.f32.mrb[20].mxu0  ;;  %1475 = vmatpush3.bf16.msra.mxu1 %v1865_v32 }
 0x115   : > { %v495_v19 = vpack.c.bf16 %v481_v17, %v480_v16  ;;  %v1365_v20 = vpop.f32.mrb[21].mxu0  ;;  %1468 = vmatprep.subr.bf16.mxu1 %v1875_v34  ;;  %v1968_v21 = vadd.f32 %v1893_v37, %v428_v18 }
 0x117   : > { %1414 = vmatprep.mubr.bf16.mxu1 %v495_v19  ;;  %v482_v25 = vmax.f32 %v1968_v21, 0.0 }
 0x118   : > { %v433_v22 = vpop.f32.mrb[22].mxu0  ;;  %1476 = vmatpush3.bf16.msra.mxu1 %v1875_v34 }
 0x119   : > { %v1972_v23 = vadd.f32 %v1893_v37, %v433_v22  ;;  %v1368_v24 = vpop.f32.mrb[23].mxu0  ;;  %1469 = vmatprep.subr.bf16.mxu1 %v1885_v36 }
 0x11b   : > { %v483_v26 = vmax.f32 %v1972_v23, 0.0 }
 0x11c   : > { %v438_v27 = vpop.f32.mrb[24].mxu0  ;;  %1477 = vmatpush3.bf16.msra.mxu1 %v1885_v36 }
 0x11d   : > { %v496_v28 = vpack.c.bf16 %v483_v26, %v482_v25  ;;  %v1371_v29 = vpop.f32.mrb[25].mxu0  ;;  %v1983_v30 = vadd.f32 %v1893_v37, %v438_v27 }
 0x11f   : > { %1415 = vmatmul.mubr.bf16.gmra.mrb[8].mxu1 %v496_v28  ;;  %v484_v34 = vmax.f32 %v1983_v30, 0.0 }
 0x120   : > { %v443_v31 = vpop.f32.mrb[26].mxu0 }
 0x121   : > { %v1986_v32 = vadd.f32 %v1893_v37, %v443_v31  ;;  %v1374_v33 = vpop.f32.mrb[27].mxu0 }
 0x123   : > { %v485_v35 = vmax.f32 %v1986_v32, 0.0 }
 0x124   : > { %v448_v36 = vpop.f32.mrb[28].mxu0 }
 0x125   : > { %v497_v38 = vpack.c.bf16 %v485_v35, %v484_v34  ;;  %v1377_v39 = vpop.f32.mrb[29].mxu0  ;;  %v1995_v41 = vadd.f32 %v1893_v37, %v448_v36 }
 0x127   : > { %1418 = vmatprep.mubr.bf16.mxu1 %v497_v38  ;;  %v486_v48 = vmax.f32 %v1995_v41, 0.0 }
 0x128   : > { %v453_v43 = vpop.f32.mrb[30].mxu0 }
 0x129   : > { %v1998_v46 = vadd.f32 %v1893_v37, %v453_v43  ;;  %v1380_v47 = vpop.f32.mrb[31].mxu0 }
 0x12b   : > { %v487_v50 = vmax.f32 %v1998_v46, 0.0 }
 0x12c   : > { %v458_v52 = vpop.f32.mrb[32].mxu0 }
 0x12d   : > { %v498_v55 = vpack.c.bf16 %v487_v50, %v486_v48  ;;  %v1383_v56 = vpop.f32.mrb[33].mxu0  ;;  %v2007_v57 = vadd.f32 %v1893_v37, %v458_v52 }
 0x12f   : > { %1419 = vmatmul.mubr.bf16.gmra.mrb[12].mxu1 %v498_v55  ;;  %v488_v1 = vmax.f32 %v2007_v57, 0.0 }
 0x130   : > { %v463_v59 = vpop.f32.mrb[34].mxu0 }
 0x131   : > { %v2010_v61 = vadd.f32 %v1893_v37, %v463_v59  ;;  %v1386_v0 = vpop.f32.mrb[35].mxu0 }
 0x133   : > { %v489_v2 = vmax.f32 %v2010_v61, 0.0 }
 0x134   : > { %v468_v4 = vpop.f32.mrb[36].mxu0 }
 0x135   : > { %v499_v6 = vpack.c.bf16 %v489_v2, %v488_v1  ;;  %v469_v9 = vadd.f32 %v1893_v37, %v468_v4  ;;  %v1389_v11 = vpop.f32.mrb[37].mxu0 }
 0x137   : > { %v2019_v13 = vmax.f32 %v469_v9, 0.0  ;;  %1422 = vmatprep.mubr.bf16.mxu1 %v499_v6 }
 0x139   : > { %v500_v14 = vpack.c.bf16 %v2019_v13, %v2019_v13 }
 0x13b   : > { %1423 = vmatmul.mubr.bf16.gmra.mrb[16].mxu1 %v500_v14 }
 0x13c   : > { %1450 = vmatprep.mubr.bf16.mxu1 %v495_v19 }
 0x143   : > { %1451 = vmatmul.mubr.bf16.vlgmr.msra.gmra.mrb[20].mxu1 %v496_v28 }
 0x144   : > { %1454 = vmatprep.mubr.bf16.mxu1 %v497_v38 }
 0x14b   : > { %1455 = vmatmul.mubr.bf16.gmra.mrb[24].mxu1 %v498_v55 }
 0x14c   : > { %1458 = vmatprep.mubr.bf16.mxu1 %v499_v6 }
 0x153   : > { %1459 = vmatmul.mubr.bf16.gmra.mrb[28].mxu1 %v500_v14 }
 0x1d2   : > { %v2023_v12 = vpop.f32.mrb[0].mxu1  ;;  %v1444_v18 = vpop.f32.mrb[40].mxu0 }
 0x1d3   : > { %v2025_v20 = vpop.f32.mrb[1].mxu1  ;;  %v775_v37 = vpop.f32.mrb[41].mxu0  ;;  %v855_v22 = vmul.f32 %v1444_v18, %v474_v53 }
 0x1d4   : > { %v2029_v24 = vpop.f32.mrb[2].mxu1  ;;  %v1445_v27 = vpop.f32.mrb[42].mxu0  ;;  %v853_v19 = vmul.f32 %v775_v37, %v472_v44 }
 0x1d5   : > { %v2033_v28 = vpop.f32.mrb[3].mxu1  ;;  %876 = vadd.xlane.f32.xlu1 %v855_v22  ;;  %v778_v29 = vpop.f32.mrb[43].mxu0  ;;  %v856_v31 = vmul.f32 %v1445_v27, %v475_v54 }
 0x1d6   : > { %872 = vadd.xlane.f32.xlu0 %v853_v19  ;;  %v854_v33 = vmul.f32 %v778_v29, %v473_v45 }
 0x1d9   : > { %878 = vadd.xlane.f32.xlu1 %v856_v31 }
 0x1da   : > { %874 = vadd.xlane.f32.xlu0 %v854_v33 }
 0x1e2   : > { %v2039_v49 = vpop.f32.mrb[4].mxu1  ;;  %v1448_v53 = vpop.f32.mrb[44].mxu0 }
 0x1e3   : > { %v859_v40 = vmul.f32 %v1448_v53, %v478_v7  ;;  %v2043_v44 = vpop.f32.mrb[5].mxu1  ;;  %v791_v36 = vpop.f32.mrb[45].mxu0 }
 0x1e4   : > { %v2045_v38 = vpop.f32.mrb[6].mxu1  ;;  %v1449_v39 = vpop.f32.mrb[46].mxu0  ;;  %v857_v45 = vmul.f32 %v791_v36, %v476_v62 }
 0x1e5   : > { %v860_v51 = vmul.f32 %v1449_v39, %v479_v8  ;;  %v2049_v54 = vpop.f32.mrb[7].mxu1  ;;  %884 = vadd.xlane.f32.xlu0 %v859_v40  ;;  %v794_v42 = vpop.f32.mrb[47].mxu0 }
 0x1e6   : > { %v858_v3 = vmul.f32 %v794_v42, %v477_v63 }
 0x1e7   : > { %886 = vadd.xlane.f32.xlu1 %v860_v51 }
 0x1e9   : > { %880 = vadd.xlane.f32.xlu0 %v857_v45 }
 0x1eb   : > { %882 = vadd.xlane.f32.xlu1 %v858_v3 }
 0x1f2   : > { %v2055_v7 = vpop.f32.mrb[8].mxu1 }
 0x1f3   : > { %v2057_v43 = vpop.f32.mrb[9].mxu1 }
 0x1f4   : > { %v2059_v47 = vpop.f32.mrb[10].mxu1 }
 0x1f5   : > { %v2061_v5 = vpop.f32.mrb[11].mxu1 }
 0x202   : > { %v2063_v8 = vpop.f32.mrb[12].mxu1 }
 0x203   : > { %v2065_v52 = vpop.f32.mrb[13].mxu1 }
 0x204   : > { %v2067_v58 = vpop.f32.mrb[14].mxu1 }
 0x205   : > { %v2069_v62 = vpop.f32.mrb[15].mxu1 }
 0x20e   : > { %v2071_v60 = vpop.f32.mrb[16].mxu1 }
 0x20f   : > { %v2073_v63 = vpop.f32.mrb[17].mxu1 }
 0x210   : > { %v1425_v55 = vpop.f32.mrb[18].mxu1 }
 0x211   : > { %v2075_v56 = vpop.f32.mrb[19].mxu1 }
 0x216   : > { %v1452_v59 = vpop.f32.mrb[20].mxu1 }
 0x217   : > { %v863_v0 = vmul.f32 %v1452_v59, %v482_v25  ;;  %v807_v4 = vpop.f32.mrb[21].mxu1 }
 0x218   : > { %v1453_v6 = vpop.f32.mrb[22].mxu1  ;;  %v861_v14 = vmul.f32 %v807_v4, %v480_v16 }
 0x219   : > { %v864_v9 = vmul.f32 %v1453_v6, %v483_v26  ;;  %v810_v11 = vpop.f32.mrb[23].mxu1  ;;  %892 = vadd.xlane.f32.xlu0 %v863_v0 }
 0x21a   : > { %v862_v18 = vmul.f32 %v810_v11, %v481_v17 }
 0x21b   : > { %894 = vadd.xlane.f32.xlu1 %v864_v9 }
 0x21d   : > { %888 = vadd.xlane.f32.xlu0 %v861_v14 }
 0x21e   : > { %v1456_v37 = vpop.f32.mrb[24].mxu1 }
 0x21f   : > { %v867_v21 = vmul.f32 %v1456_v37, %v486_v48  ;;  %v823_v25 = vpop.f32.mrb[25].mxu1  ;;  %890 = vadd.xlane.f32.xlu1 %v862_v18 }
 0x220   : > { %v1457_v22 = vpop.f32.mrb[26].mxu1  ;;  %v865_v10 = vmul.f32 %v823_v25, %v484_v34 }
 0x221   : > { %v868_v23 = vmul.f32 %v1457_v22, %v487_v50  ;;  %v826_v26 = vpop.f32.mrb[27].mxu1  ;;  %900 = vadd.xlane.f32.xlu0 %v867_v21 }
 0x222   : > { %v866_v15 = vmul.f32 %v826_v26, %v485_v35 }
 0x223   : > { %902 = vadd.xlane.f32.xlu1 %v868_v23 }
 0x225   : > { %896 = vadd.xlane.f32.xlu0 %v865_v10 }
 0x226   : > { %v1460_v16 = vpop.f32.mrb[28].mxu1 }
 0x227   : > { %v839_v17 = vpop.f32.mrb[29].mxu1  ;;  %898 = vadd.xlane.f32.xlu1 %v866_v15  ;;  %v871_v30 = vmul.f32 %v1460_v16, %v2019_v13 }
 0x228   : > { %v869_v41 = vmul.f32 %v839_v17, %v488_v1  ;;  %v1461_v48 = vpop.f32.mrb[30].mxu1 }
 0x229   : > { %v842_v27 = vpop.f32.mrb[31].mxu1 }
 0x22a   : > { %v870_v46 = vmul.f32 %v842_v27, %v489_v2  ;;  %904 = vadd.xlane.f32.xlu0 %v869_v41 }
 0x22c   : > { %906 = vadd.xlane.f32.xlu1 %v870_v46 }
 0x22e   : > { %908 = vadd.xlane.f32.xlu0 %v871_v30 }
 0x262   : > { %v877_v32 = vpop.xlane.xlu1 %876 }
 0x263   : > { %v912_v34 = vadd.f32 1e-12, %v877_v32  ;;  %v873_v35 = vpop.xlane.xlu0 %872 }
 0x264   : > { %v910_v50 = vadd.f32 1e-12, %v873_v35 }
 0x265   : > { %1538 = vrsqrt.f32 %v912_v34 }
 0x266   : > { %v879_v19 = vpop.xlane.xlu1 %878  ;;  %1540 = vrsqrt.f32 %v910_v50 }
 0x267   : > { %v913_v57 = vadd.f32 1e-12, %v879_v19  ;;  %v875_v1 = vpop.xlane.xlu0 %874 }
 0x268   : > { %v911_v29 = vadd.f32 1e-12, %v875_v1 }
 0x269   : > { %1542 = vrsqrt.f32 %v913_v57 }
 0x26a   : > { %1544 = vrsqrt.f32 %v911_v29 }
 0x26f   : > { %v1539_v61 = vpop.eup %1538 }
 0x270   : > { %v1541_v2 = vpop.eup %1540  ;;  %v950_v40 = vmul.f32 %v1539_v61, %v2023_v12 }
 0x271   : > { %v948_v51 = vmul.f32 %v1541_v2, %v2025_v20 }
 0x272   : > { %v885_v13 = vpop.xlane.xlu0 %884 }
 0x273   : > { %v1543_v31 = vpop.eup %1542  ;;  %v916_v33 = vadd.f32 1e-12, %v885_v13 }
 0x274   : > { %v1545_v53 = vpop.eup %1544  ;;  %v951_v36 = vmul.f32 %v1543_v31, %v2029_v24  ;;  %v887_v39 = vpop.xlane.xlu1 %886 }
 0x275   : > { %v949_v42 = vmul.f32 %v1545_v53, %v2033_v28  ;;  %1546 = vrsqrt.f32 %v916_v33  ;;  %v917_v45 = vadd.f32 1e-12, %v887_v39 }
 0x276   : > { %v1230_v3 = vpack.c.bf16 %v951_v36, %v950_v40  ;;  %v881_v55 = vpop.xlane.xlu0 %880 }
 0x277   : > { %v1225_v59 = vpack.c.bf16 %v949_v42, %v948_v51  ;;  %1548 = vrsqrt.f32 %v917_v45  ;;  %v914_v0 = vadd.f32 1e-12, %v881_v55 }
 0x278   : > { %1267 = vst [vmem:[%s2105_s16 + $0x8] sm:$0xff] %v1230_v3   ;;  %v883_v12 = vpop.xlane.xlu1 %882 }
 0x279   : > { %1226 = vst [vmem:[%s2105_s16] sm:$0xff] %v1225_v59   ;;  %1550 = vrsqrt.f32 %v914_v0  ;;  %v915_v20 = vadd.f32 1e-12, %v883_v12 }
 0x27b   : > { %1552 = vrsqrt.f32 %v915_v20 }
 0x27f   : > { %v1547_v24 = vpop.eup %1546 }
 0x280   : > { %v954_v4 = vmul.f32 %v1547_v24, %v2039_v49 }
 0x281   : > { %v1549_v28 = vpop.eup %1548 }
 0x282   : > { %v955_v6 = vmul.f32 %v1549_v28, %v2045_v38 }
 0x283   : > { %v1551_v9 = vpop.eup %1550 }
 0x284   : > { %v1240_v11 = vpack.c.bf16 %v955_v6, %v954_v4  ;;  %v952_v18 = vmul.f32 %v1551_v9, %v2043_v44 }
 0x285   : > { %v1553_v14 = vpop.eup %1552 }
 0x286   : > { %1269 = vst [vmem:[%s2105_s16 + $0x18] sm:$0xff] %v1240_v11   ;;  %v953_v37 = vmul.f32 %v1553_v14, %v2049_v54 }
 0x288   : > { %v1235_v21 = vpack.c.bf16 %v953_v37, %v952_v18 }
 0x28a   : > { %1268 = vst [vmem:[%s2105_s16 + $0x10] sm:$0xff] %v1235_v21  }
 0x2a6   : > { %v893_v25 = vpop.xlane.xlu0 %892 }
 0x2a7   : > { %v920_v22 = vadd.f32 1e-12, %v893_v25 }
 0x2a8   : > { %v895_v23 = vpop.xlane.xlu1 %894 }
 0x2a9   : > { %1554 = vrsqrt.f32 %v920_v22  ;;  %v921_v26 = vadd.f32 1e-12, %v895_v23 }
 0x2aa   : > { %v889_v10 = vpop.xlane.xlu0 %888 }
 0x2ab   : > { %1556 = vrsqrt.f32 %v921_v26  ;;  %v918_v49 = vadd.f32 1e-12, %v889_v10 }
 0x2ac   : > { %v891_v15 = vpop.xlane.xlu1 %890 }
 0x2ad   : > { %1558 = vrsqrt.f32 %v918_v49  ;;  %v919_v38 = vadd.f32 1e-12, %v891_v15 }
 0x2ae   : > { %v901_v16 = vpop.xlane.xlu0 %900 }
 0x2af   : > { %1560 = vrsqrt.f32 %v919_v38  ;;  %v924_v17 = vadd.f32 1e-12, %v901_v16 }
 0x2b0   : > { %v903_v41 = vpop.xlane.xlu1 %902 }
 0x2b1   : > { %1562 = vrsqrt.f32 %v924_v17  ;;  %v925_v44 = vadd.f32 1e-12, %v903_v41 }
 0x2b2   : > { %v897_v54 = vpop.xlane.xlu0 %896 }
 0x2b3   : > { %v1555_v48 = vpop.eup %1554  ;;  %1564 = vrsqrt.f32 %v925_v44  ;;  %v922_v27 = vadd.f32 1e-12, %v897_v54 }
 0x2b4   : > { %v899_v46 = vpop.xlane.xlu1 %898  ;;  %v958_v34 = vmul.f32 %v1555_v48, %v2055_v7 }
 0x2b5   : > { %v1557_v30 = vpop.eup %1556  ;;  %1566 = vrsqrt.f32 %v922_v27  ;;  %v923_v32 = vadd.f32 1e-12, %v899_v46 }
 0x2b6   : > { %v959_v35 = vmul.f32 %v1557_v30, %v2059_v47 }
 0x2b7   : > { %v1559_v50 = vpop.eup %1558  ;;  %1568 = vrsqrt.f32 %v923_v32  ;;  %v905_v19 = vpop.xlane.xlu0 %904 }
 0x2b8   : > { %v1250_v57 = vpack.c.bf16 %v959_v35, %v958_v34  ;;  %v926_v1 = vadd.f32 1e-12, %v905_v19  ;;  %v956_v2 = vmul.f32 %v1559_v50, %v2057_v43 }
 0x2b9   : > { %v1561_v29 = vpop.eup %1560  ;;  %v907_v61 = vpop.xlane.xlu1 %906 }
 0x2ba   : > { %1271 = vst [vmem:[%s2105_s16 + $0x28] sm:$0xff] %v1250_v57   ;;  %v957_v13 = vmul.f32 %v1561_v29, %v2061_v5  ;;  %1570 = vrsqrt.f32 %v926_v1  ;;  %v927_v31 = vadd.f32 1e-12, %v907_v61 }
 0x2bb   : > { %v1563_v33 = vpop.eup %1562  ;;  %v909_v7 = vpop.xlane.xlu0 %908 }
 0x2bc   : > { %v1245_v53 = vpack.c.bf16 %v957_v13, %v956_v2  ;;  %1572 = vrsqrt.f32 %v927_v31  ;;  %v928_v47 = vadd.f32 1e-12, %v909_v7  ;;  %v962_v36 = vmul.f32 %v1563_v33, %v2063_v8 }
 0x2bd   : > { %v1565_v40 = vpop.eup %1564 }
 0x2be   : > { %1270 = vst [vmem:[%s2105_s16 + $0x20] sm:$0xff] %v1245_v53   ;;  %v963_v39 = vmul.f32 %v1565_v40, %v2067_v58  ;;  %1574 = vrsqrt.f32 %v928_v47 }
 0x2bf   : > { %v1567_v43 = vpop.eup %1566 }
 0x2c0   : > { %v1260_v5 = vpack.c.bf16 %v963_v39, %v962_v36  ;;  %v960_v42 = vmul.f32 %v1567_v43, %v2065_v52 }
 0x2c1   : > { %v1569_v51 = vpop.eup %1568 }
 0x2c2   : > { %1273 = vst [vmem:[%s2105_s16 + $0x38] sm:$0xff] %v1260_v5   ;;  %v961_v45 = vmul.f32 %v1569_v51, %v2069_v62 }
 0x2c4   : > { %v1571_v3 = vpop.eup %1570  ;;  %v1255_v55 = vpack.c.bf16 %v961_v45, %v960_v42 }
 0x2c5   : > { %v964_v8 = vmul.f32 %v1571_v3, %v2073_v63 }
 0x2c6   : > { %v1573_v59 = vpop.eup %1572  ;;  %1272 = vst [vmem:[%s2105_s16 + $0x30] sm:$0xff] %v1255_v55  }
 0x2c7   : > { %v965_v58 = vmul.f32 %v1573_v59, %v2075_v56 }
 0x2c8   : > { %v1575_v0 = vpop.eup %1574 }
 0x2c9   : > { %v1265_v12 = vpack.c.bf16 %v965_v58, %v964_v8  ;;  %v966_v20 = vmul.f32 %v1575_v0, %v2071_v60 }
 0x2cb   : > { %1274 = vst [vmem:[%s2105_s16 + $0x40] sm:$0xff] %v1265_v12   ;;  %v1220_v52 = vpack.c.bf16 %v966_v20, %v966_v20 }
 0x2cd   : > { %1062 = vst [vmem:[%s2105_s16 + $0x48] sm:$0xf] %v1220_v52 }
 0x2ce   : > { %1589 = shalt.err (!%p1586_p3)
}
 0x2cf   : > { %s1590_s10 = scalar_lea.hbm %s2135_s30, 1216  ;;  %s1594_s13 = scalar_lea.hbm %s2189_s5, 2432 }
 0x2d0   : > { %p1591_p4 = scmp.ne.s32.totalorder %s2135_s30, %s1590_s10  ;;  %p1595_p9 = scmp.lt.u32.totalorder %s2135_s30, %s2189_s5 }
 0x2d1   : > { %p1596_p10 = scmp.lt.u32.totalorder %s1594_s13, %s1590_s10  ;;  %p1598_p12 = scmp.lt.u32.totalorder %s1590_s10, %s2135_s30 }
 0x2d2   : > { %p1592_p7 = pnand %p1591_p4, %p1713_p5 }
 0x2d3   : > { %p1597_p11 = por %p1596_p10, %p1595_p9 }
 0x2d4   : > { %p1593_p8 = pneg %p1592_p7 }
 0x2d5   : > { %p1599_p13 = por %p1598_p12, %p1597_p11 }
 0x2d7   : > { %p1600_p0 = pnand %p1599_p13, %p1593_p8 }
 0x2d9   : > { %1603 = shalt.err (!%p1600_p0)
}
 0x2da   : > { %s1643_s16 = smov 64   ;;  %s1644_s17 = smov 4  }
 0x2db   : > { %1479 = dma.vmem_to_hbm [thread:$0]  (%p1713_p5), %s2137_s23, 1216, %s2135_s30, %s2143_s22, %s1643_s16, %s1643_s16, %s1644_s17  }
 0x2dc PF: > { %p1485_p1 = scmp.ge.s32.totalorder %s1638_s21, 2  ;;  %s1092_s25 = sand.u32 1, %s1626_s18  }
 0x2dd   : > { %s1093_s26 = scalar_lea.sflag [#allocation3], %s1092_s25 }
 0x2de   : > { %p1482_p2 = pnand %p1485_p1, %p1717_p6 }
 0x2e0   : > { %1621 = dma.done.wait (!%p1482_p2), %s1093_s26, 1216  }
 0x2e1   : > { %1623 = vsyncadd (!%p1482_p2), %s1093_s26, 4294966080  ;;  %p15_p3 = scmp.ge.s32.totalorder %s1700_s24, 4   ;;  %s2192_s18 = smov %s1630_s19 }
 0x2e2   : > { %s2193_s19 = smov %s1634_s20  ;;  %s2194_s20 = smov %s1711_s27 }
 0x2e3   : > { %s2195_s21 = smov %s1700_s24  ;;  %17 = sbr.rel (!%p15_p3) target bundleno = 3 (0x3), region = 75 }
 0x2ea   :  { %1098 = vsyncpa [#allocation3], 1 }
 0x2eb   :  { %1100 = vsyncpa [#allocation3 + $0x1], 1 }

</bundles_post_ra>
